<compile_context>
chip_gen: v5e
topology: v5e:2x2
jax: 0.10.0
libtpu: 0.0.40
codegen_flags: <defaults>
</compile_context>

<pallas_src>
import jax
import jax.numpy as jnp
from jax.experimental import pallas as pl
from jax.experimental.pallas import tpu as pltpu


def _round_up(x, m):
    return ((x + m - 1) // m) * m


def fpmc_kernel(a_ref, b_ref, out_ref):
    # a_ref, b_ref: (tb, K) f32 packed embedding slabs.
    # Single fused multiply + single cross-lane reduce gives x_MF + x_FMC.
    out_ref[...] = jnp.sum(a_ref[...] * b_ref[...], axis=1, keepdims=True)


def fpmc_forward(params, uid, basket_prev, iid, *, tb=4096):
    VUI, VIU, VIL, VLI = params["VUI"], params["VIU"], params["VIL"], params["VLI"]

    # Gather + pack: two (B, k_UI + k_IL) slabs so the kernel does one fused
    # multiply-reduce over a full 128-lane row (for the default 64+64).
    a = jnp.concatenate([VUI[uid], VIL[iid]], axis=1)           # (B, K)
    b = jnp.concatenate([VIU[iid], VLI[basket_prev]], axis=1)   # (B, K)

    B, K = a.shape

    # Tile: multiple of 128 (sublane/lane friendly), clamped to the padded
    # problem size so tiny batches stay a single grid step.
    tb = min(_round_up(tb, 128), _round_up(B, 128))
    num_tiles = pl.cdiv(B, tb)
    B_pad = num_tiles * tb
    if B_pad != B:
        pad = B_pad - B
        a = jnp.pad(a, ((0, pad), (0, 0)))   # zero rows reduce to zero
        b = jnp.pad(b, ((0, pad), (0, 0)))

    out = pl.pallas_call(
        fpmc_kernel,
        out_shape=jax.ShapeDtypeStruct((B_pad, 1), jnp.float32),
        grid_spec=pltpu.PrefetchScalarGridSpec(
            num_scalar_prefetch=0,
            grid=(num_tiles,),
            in_specs=[
                pl.BlockSpec((tb, K), lambda i: (i, 0)),
                pl.BlockSpec((tb, K), lambda i: (i, 0)),
            ],
            out_specs=pl.BlockSpec((tb, 1), lambda i: (i, 0)),
        ),
        compiler_params=pltpu.CompilerParams(
            dimension_semantics=("parallel",)),
    )(a, b)

    return out[:B, 0]   # (B,)


def init_params(key, n_users, n_items, k_UI=64, k_IL=64):
    # Deterministic init mirroring nn.Embedding(...).weight.data.uniform_(0, 0.05)
    k1, k2, k3, k4 = jax.random.split(key, 4)
    u = lambda k, shape: jax.random.uniform(k, shape, jnp.float32, 0.0, 0.05)
    return {
        "VIL": u(k1, (n_items, k_IL)),
        "VLI": u(k2, (n_items, k_IL)),
        "VUI": u(k3, (n_users, k_UI)),
        "VIU": u(k4, (n_items, k_UI)),
    }


if __name__ == "__main__":
    n_users, n_items, k_UI, k_IL = 10, 20, 64, 64
    B = 300   # deliberately NOT a tile multiple: exercises the padded tail

    key = jax.random.PRNGKey(0)
    pkey, ukey, bkey, ikey = jax.random.split(key, 4)
    params = init_params(pkey, n_users, n_items, k_UI, k_IL)

    uid = jax.random.randint(ukey, (B,), 0, n_users, dtype=jnp.int32)
    basket_prev = jax.random.randint(bkey, (B,), 0, n_items, dtype=jnp.int32)
    iid = jax.random.randint(ikey, (B,), 0, n_items, dtype=jnp.int32)

    # Pure-JAX reference of the PyTorch forward semantics.
    ref = (jnp.sum(params["VUI"][uid] * params["VIU"][iid], axis=1)
           + jnp.sum(params["VIL"][iid] * params["VLI"][basket_prev], axis=1))

    # Default (large, clamped) tile: single grid step at this batch size.
    out = jax.block_until_ready(fpmc_forward(params, uid, basket_prev, iid))
    assert out.shape == (B,)
    assert out.dtype == jnp.float32
    assert jnp.allclose(out, ref, atol=1e-6, rtol=1e-6)

    # Small tile: multiple grid steps + padded final tile (checks index_map
    # correctness across re-tiling).
    out_multi = jax.block_until_ready(
        fpmc_forward(params, uid, basket_prev, iid, tb=128))
    assert jnp.allclose(out_multi, ref, atol=1e-6, rtol=1e-6)

    print("KERNEL_OK")
</pallas_src>

<mosaic_0001>
module attributes {stable_mosaic.version = 11 : i64} {
  func.func @fpmc_kernel(%arg0: i32, %arg1: memref<384x128xf32, #tpu.memory_space<vmem>>, %arg2: memref<384x128xf32, #tpu.memory_space<vmem>>, %arg3: memref<384x1xf32, #tpu.memory_space<vmem>>) attributes {dimension_semantics = [#tpu.dimension_semantics<parallel>], iteration_bounds = array<i64: 1>, scalar_prefetch = 0 : i64, scratch_operands = 0 : i64, tpu.core_type = #tpu.core_type<tc>, window_params = [{transform_indices = @transform_0, window_bounds = array<i64: 384, 128>}, {transform_indices = @transform_1, window_bounds = array<i64: 384, 128>}, {transform_indices = @transform_2, window_bounds = array<i64: 384, 1>}]} {
    %c0 = arith.constant 0 : index
    %c0_0 = arith.constant 0 : index
    %0 = vector.load %arg1[%c0, %c0_0] : memref<384x128xf32, #tpu.memory_space<vmem>>, vector<384x128xf32>
    %c0_1 = arith.constant 0 : index
    %c0_2 = arith.constant 0 : index
    %1 = vector.load %arg2[%c0_1, %c0_2] : memref<384x128xf32, #tpu.memory_space<vmem>>, vector<384x128xf32>
    %2 = arith.mulf %0, %1 : vector<384x128xf32>
    %cst = arith.constant dense<0.000000e+00> : vector<384xf32>
    %3 = vector.multi_reduction <add>, %2, %cst [1] : vector<384x128xf32> to vector<384xf32>
    %4 = vector.shape_cast %3 : vector<384xf32> to vector<384x1xf32>
    %c0_3 = arith.constant 0 : index
    %c0_4 = arith.constant 0 : index
    %5 = vector.load %arg3[%c0_3, %c0_4] : memref<384x1xf32, #tpu.memory_space<vmem>>, vector<384x1xf32>
    tpu.vector_store %arg3[%c0_3, %c0_4], %4 {strides = array<i32>} : memref<384x1xf32, #tpu.memory_space<vmem>>, vector<384x1xf32>,
    return
  }
  func.func @transform_0(%arg0: i32) -> (i32, i32) {
    %c0_i32 = arith.constant 0 : i32
    %c0_i32_0 = arith.constant 0 : i32
    return %arg0, %c0_i32 : i32, i32
  }
  func.func @transform_1(%arg0: i32) -> (i32, i32) {
    %c0_i32 = arith.constant 0 : i32
    %c0_i32_0 = arith.constant 0 : i32
    return %arg0, %c0_i32 : i32, i32
  }
  func.func @transform_2(%arg0: i32) -> (i32, i32) {
    %c0_i32 = arith.constant 0 : i32
    %c0_i32_0 = arith.constant 0 : i32
    return %arg0, %c0_i32 : i32, i32
  }
}

</mosaic_0001>

<bundles_post_ra>
// kernel: tpu_custom_call.1
= control target key start
LH: loop header
LB: loop body
LE: loop exit
PB: predicated region body
PF: predicated region fallthrough
CT: control target
= control target key end

     0   :  { %7 = vsyncpa [#allocation3], 0  ;;  %s611_s0 = inlined_call_operand.hbm [shape: f32[384,128], index: 0, kind: input, shape index: {}]   ;;  %s612_s1 = inlined_call_operand.hbm [shape: f32[384,128], index: 1, kind: input, shape index: {}]   ;;  %s613_s2 = inlined_call_operand.vmem [shape: f32[384,1], index: 2, kind: output, shape index: {}]  }
   0x1   :  { %s13_s11 = sshll.u32 %s611_s0, 4  ;;  %s14_s11 = int_to_ptr.hbm [resolvable:$true] %s13_s11 }
   0x2   :  { %8 = vsyncpa [#allocation5], 0  ;;  %s394_s12 = smov [#allocation2]   ;;  %s26_s16 = sshll.u32 %s612_s1, 4  ;;  %s27_s16 = int_to_ptr.hbm [resolvable:$true] %s26_s16 }
   0x3   :  { %s15_s13 = sshll.u32 %s394_s12, 4  ;;  %s395_s17 = smov 128   ;;  %s16_s13 = int_to_ptr.vmem [resolvable:$true] %s15_s13 }
   0x4   :  { %s396_s18 = smov 8   ;;  %s397_s19 = smov [#allocation4]  }
   0x5   :  { %21 = dma.hbm_to_vmem [thread:$0]  %s14_s11, 6144, %s16_s13, [#allocation3], %s395_s17, %s395_s17, %s396_s18  }
   0x6   :  { %s28_s20 = sshll.u32 %s397_s19, 4  ;;  %s29_s20 = int_to_ptr.vmem [resolvable:$true] %s28_s20 }
   0x7   :  { %34 = dma.hbm_to_vmem [thread:$0]  %s27_s16, 6144, %s29_s20, [#allocation5], %s395_s17, %s395_s17, %s396_s18  }
   0x8   :  { %390 = dma.done.wait [#allocation3], 6144  }
   0x9   :  { %391 = vsyncadd [#allocation3], 4294961152 }
   0xa   :  { %392 = dma.done.wait [#allocation5], 6144  }
   0xb   :  { %393 = vsyncadd [#allocation5], 4294961152  ;;  %v47_v0 = vld [vmem:[#allocation2 + $0x20] sm:$0xff]  ;;  %v45_v2 = vld [vmem:[#allocation2 + $0x10] sm:$0xff]  ;;  %vm283_vm0 = vcmask 7168  }
   0xc   :  { %v95_v1 = vld [vmem:[#allocation4 + $0x20] sm:$0xff]  ;;  %v93_v4 = vld [vmem:[#allocation4 + $0x10] sm:$0xff]  ;;  %v48_v9 = vld [vmem:[#allocation2 + $0x28] sm:$0xff] }
   0xd   :  { %v143_v3 = vmul.f32 %v95_v1, %v47_v0  ;;  %v43_v5 = vld [vmem:[#allocation2] sm:$0xff]  ;;  %v141_v7 = vmul.f32 %v93_v4, %v45_v2  ;;  %v96_v10 = vld [vmem:[#allocation4 + $0x28] sm:$0xff]  ;;  %v46_v11 = vld [vmem:[#allocation2 + $0x18] sm:$0xff] }
   0xe   :  { %v91_v6 = vld [vmem:[#allocation4] sm:$0xff]  ;;  %v94_v12 = vld [vmem:[#allocation4 + $0x18] sm:$0xff]  ;;  %v44_v13 = vld [vmem:[#allocation2 + $0x8] sm:$0xff]  ;;  %v144_v15 = vmul.f32 %v96_v10, %v48_v9 }
   0xf   :  { %v139_v8 = vmul.f32 %v91_v6, %v43_v5  ;;  %195 = vadd.xlane.f32.xlu2 %v143_v3  ;;  %191 = vadd.xlane.f32.xlu1 %v141_v7  ;;  %v92_v14 = vld [vmem:[#allocation4 + $0x8] sm:$0xff]  ;;  %v142_v16 = vmul.f32 %v94_v12, %v46_v11  ;;  %v51_v18 = vld [vmem:[#allocation2 + $0x40] sm:$0xff]  ;;  %v50_v20 = vld [vmem:[#allocation2 + $0x38] sm:$0xff] }
  0x10   :  { %v140_v17 = vmul.f32 %v92_v14, %v44_v13  ;;  %v99_v19 = vld [vmem:[#allocation4 + $0x40] sm:$0xff]  ;;  %v98_v21 = vld [vmem:[#allocation4 + $0x38] sm:$0xff]  ;;  %v49_v22 = vld [vmem:[#allocation2 + $0x30] sm:$0xff] }
  0x11   :  { %187 = vadd.xlane.f32.xlu0 %v139_v8  ;;  %v97_v23 = vld [vmem:[#allocation4 + $0x30] sm:$0xff]  ;;  %v147_v24 = vmul.f32 %v99_v19, %v51_v18  ;;  %v146_v25 = vmul.f32 %v98_v21, %v50_v20  ;;  %v54_v27 = vld [vmem:[#allocation2 + $0x58] sm:$0xff]  ;;  %v52_v31 = vld [vmem:[#allocation2 + $0x48] sm:$0xff] }
  0x12   :  { %v145_v26 = vmul.f32 %v97_v23, %v49_v22  ;;  %v102_v28 = vld [vmem:[#allocation4 + $0x58] sm:$0xff]  ;;  %v53_v29 = vld [vmem:[#allocation2 + $0x50] sm:$0xff]  ;;  %v100_v32 = vld [vmem:[#allocation4 + $0x48] sm:$0xff] }
  0x13   :  { %v101_v30 = vld [vmem:[#allocation4 + $0x50] sm:$0xff]  ;;  %v150_v33 = vmul.f32 %v102_v28, %v54_v27  ;;  %v148_v35 = vmul.f32 %v100_v32, %v52_v31  ;;  %v56_v38 = vld [vmem:[#allocation2 + $0x68] sm:$0xff]  ;;  %v55_v40 = vld [vmem:[#allocation2 + $0x60] sm:$0xff] }
  0x14   :  { %v149_v34 = vmul.f32 %v101_v30, %v53_v29  ;;  %v57_v36 = vld [vmem:[#allocation2 + $0x70] sm:$0xff]  ;;  %v104_v39 = vld [vmem:[#allocation4 + $0x68] sm:$0xff]  ;;  %v103_v41 = vld [vmem:[#allocation4 + $0x60] sm:$0xff] }
  0x15   :  { %v105_v37 = vld [vmem:[#allocation4 + $0x70] sm:$0xff]  ;;  %v152_v43 = vmul.f32 %v104_v39, %v56_v38  ;;  %v151_v44 = vmul.f32 %v103_v41, %v55_v40  ;;  %v60_v45 = vld [vmem:[#allocation2 + $0x88] sm:$0xff]  ;;  %v59_v47 = vld [vmem:[#allocation2 + $0x80] sm:$0xff] }
  0x16   :  { %v153_v42 = vmul.f32 %v105_v37, %v57_v36  ;;  %v108_v46 = vld [vmem:[#allocation4 + $0x88] sm:$0xff]  ;;  %v107_v48 = vld [vmem:[#allocation4 + $0x80] sm:$0xff]  ;;  %v58_v49 = vld [vmem:[#allocation2 + $0x78] sm:$0xff] }
  0x17   :  { %197 = vadd.xlane.f32.xlu2 %v144_v15  ;;  %193 = vadd.xlane.f32.xlu1 %v142_v16  ;;  %v106_v50 = vld [vmem:[#allocation4 + $0x78] sm:$0xff]  ;;  %v156_v51 = vmul.f32 %v108_v46, %v60_v45  ;;  %v155_v52 = vmul.f32 %v107_v48, %v59_v47  ;;  %v63_v54 = vld [vmem:[#allocation2 + $0xa0] sm:$0xff]  ;;  %v61_v58 = vld [vmem:[#allocation2 + $0x90] sm:$0xff] }
  0x18   :  { %v154_v53 = vmul.f32 %v106_v50, %v58_v49  ;;  %v111_v55 = vld [vmem:[#allocation4 + $0xa0] sm:$0xff]  ;;  %v62_v56 = vld [vmem:[#allocation2 + $0x98] sm:$0xff]  ;;  %v109_v59 = vld [vmem:[#allocation4 + $0x90] sm:$0xff] }
  0x19   :  { %189 = vadd.xlane.f32.xlu0 %v140_v17  ;;  %v110_v57 = vld [vmem:[#allocation4 + $0x98] sm:$0xff]  ;;  %v159_v60 = vmul.f32 %v111_v55, %v63_v54  ;;  %v157_v62 = vmul.f32 %v109_v59, %v61_v58  ;;  %v65_v1 = vld [vmem:[#allocation2 + $0xb0] sm:$0xff]  ;;  %v64_v3 = vld [vmem:[#allocation2 + $0xa8] sm:$0xff] }
  0x1a   :  { %v158_v61 = vmul.f32 %v110_v57, %v62_v56  ;;  %v66_v63 = vld [vmem:[#allocation2 + $0xb8] sm:$0xff]  ;;  %v113_v2 = vld [vmem:[#allocation4 + $0xb0] sm:$0xff]  ;;  %v112_v4 = vld [vmem:[#allocation4 + $0xa8] sm:$0xff] }
  0x1b   :  { %v114_v0 = vld [vmem:[#allocation4 + $0xb8] sm:$0xff]  ;;  %v161_v6 = vmul.f32 %v113_v2, %v65_v1  ;;  %v160_v7 = vmul.f32 %v112_v4, %v64_v3  ;;  %v69_v8 = vld [vmem:[#allocation2 + $0xd0] sm:$0xff]  ;;  %v68_v10 = vld [vmem:[#allocation2 + $0xc8] sm:$0xff] }
  0x1c   :  { %v162_v5 = vmul.f32 %v114_v0, %v66_v63  ;;  %v117_v9 = vld [vmem:[#allocation4 + $0xd0] sm:$0xff]  ;;  %v116_v11 = vld [vmem:[#allocation4 + $0xc8] sm:$0xff]  ;;  %v67_v12 = vld [vmem:[#allocation2 + $0xc0] sm:$0xff] }
  0x1d   :  { %v115_v13 = vld [vmem:[#allocation4 + $0xc0] sm:$0xff]  ;;  %v165_v14 = vmul.f32 %v117_v9, %v69_v8  ;;  %v164_v15 = vmul.f32 %v116_v11, %v68_v10  ;;  %v72_v17 = vld [vmem:[#allocation2 + $0xe8] sm:$0xff]  ;;  %v70_v21 = vld [vmem:[#allocation2 + $0xd8] sm:$0xff] }
  0x1e   :  { %v163_v16 = vmul.f32 %v115_v13, %v67_v12  ;;  %v120_v18 = vld [vmem:[#allocation4 + $0xe8] sm:$0xff]  ;;  %v71_v19 = vld [vmem:[#allocation2 + $0xe0] sm:$0xff]  ;;  %v118_v22 = vld [vmem:[#allocation4 + $0xd8] sm:$0xff] }
  0x1f   :  { %203 = vadd.xlane.f32.xlu2 %v147_v24  ;;  %201 = vadd.xlane.f32.xlu1 %v146_v25  ;;  %v119_v20 = vld [vmem:[#allocation4 + $0xe0] sm:$0xff]  ;;  %v168_v23 = vmul.f32 %v120_v18, %v72_v17  ;;  %v166_v25 = vmul.f32 %v118_v22, %v70_v21  ;;  %v74_v28 = vld [vmem:[#allocation2 + $0xf8] sm:$0xff]  ;;  %v73_v30 = vld [vmem:[#allocation2 + $0xf0] sm:$0xff] }
  0x20   :  { %v167_v24 = vmul.f32 %v119_v20, %v71_v19  ;;  %v123_v27 = vld [vmem:[#allocation4 + $0x100] sm:$0xff]  ;;  %v122_v29 = vld [vmem:[#allocation4 + $0xf8] sm:$0xff]  ;;  %v121_v31 = vld [vmem:[#allocation4 + $0xf0] sm:$0xff] }
  0x21   :  { %199 = vadd.xlane.f32.xlu0 %v145_v26  ;;  %v75_v26 = vld [vmem:[#allocation2 + $0x100] sm:$0xff]  ;;  %v126_v36 = vld [vmem:[#allocation4 + $0x118] sm:$0xff]  ;;  %v77_v37 = vld [vmem:[#allocation2 + $0x110] sm:$0xff] }
  0x22   :  { %v171_v32 = vmul.f32 %v123_v27, %v75_v26  ;;  %v125_v38 = vld [vmem:[#allocation4 + $0x110] sm:$0xff]  ;;  %v76_v39 = vld [vmem:[#allocation2 + $0x108] sm:$0xff]  ;;  %v79_v48 = vld [vmem:[#allocation2 + $0x120] sm:$0xff] }
  0x23   :  { %v124_v40 = vld [vmem:[#allocation4 + $0x108] sm:$0xff]  ;;  %v129_v45 = vld [vmem:[#allocation4 + $0x130] sm:$0xff]  ;;  %v127_v49 = vld [vmem:[#allocation4 + $0x120] sm:$0xff] }
  0x24   :  { %v80_v46 = vld [vmem:[#allocation2 + $0x128] sm:$0xff]  ;;  %v83_v55 = vld [vmem:[#allocation2 + $0x140] sm:$0xff]  ;;  %v82_v57 = vld [vmem:[#allocation2 + $0x138] sm:$0xff] }
  0x25   :  { %v128_v47 = vld [vmem:[#allocation4 + $0x128] sm:$0xff]  ;;  %v131_v56 = vld [vmem:[#allocation4 + $0x140] sm:$0xff]  ;;  %v130_v58 = vld [vmem:[#allocation4 + $0x138] sm:$0xff] }
  0x26   :  { %v132_v54 = vld [vmem:[#allocation4 + $0x148] sm:$0xff]  ;;  %v135_v63 = vld [vmem:[#allocation4 + $0x160] sm:$0xff]  ;;  %v86_v0 = vld [vmem:[#allocation2 + $0x158] sm:$0xff] }
  0x27   :  { %209 = vadd.xlane.f32.xlu2 %v150_v33  ;;  %207 = vadd.xlane.f32.xlu1 %v149_v34  ;;  %v170_v33 = vmul.f32 %v122_v29, %v74_v28  ;;  %v169_v34 = vmul.f32 %v121_v31, %v73_v30  ;;  %v134_v1 = vld [vmem:[#allocation4 + $0x158] sm:$0xff]  ;;  %v85_v2 = vld [vmem:[#allocation2 + $0x150] sm:$0xff]  ;;  %v88_v11 = vld [vmem:[#allocation2 + $0x168] sm:$0xff] }
  0x28   :  { %v133_v3 = vld [vmem:[#allocation4 + $0x150] sm:$0xff]  ;;  %v138_v8 = vld [vmem:[#allocation4 + $0x178] sm:$0xff]  ;;  %v136_v12 = vld [vmem:[#allocation4 + $0x168] sm:$0xff] }
  0x29   :  { %205 = vadd.xlane.f32.xlu0 %v148_v35  ;;  %v78_v35 = vld [vmem:[#allocation2 + $0x118] sm:$0xff]  ;;  %v89_v9 = vld [vmem:[#allocation2 + $0x170] sm:$0xff]  ;;  %v184_v18 = vmul.f32 %v136_v12, %v88_v11 }
  0x2a   :  { %v174_v41 = vmul.f32 %v126_v36, %v78_v35  ;;  %v137_v10 = vld [vmem:[#allocation4 + $0x170] sm:$0xff] }
  0x2b   :  { %v185_v17 = vmul.f32 %v137_v10, %v89_v9 }
  0x2f   :  { %215 = vadd.xlane.f32.xlu2 %v153_v42  ;;  %213 = vadd.xlane.f32.xlu1 %v152_v43  ;;  %v173_v42 = vmul.f32 %v125_v38, %v77_v37  ;;  %v172_v43 = vmul.f32 %v124_v40, %v76_v39 }
  0x31   :  { %211 = vadd.xlane.f32.xlu0 %v151_v44  ;;  %v81_v44 = vld [vmem:[#allocation2 + $0x130] sm:$0xff] }
  0x32   :  { %v177_v50 = vmul.f32 %v129_v45, %v81_v44 }
  0x37   :  { %221 = vadd.xlane.f32.xlu2 %v156_v51  ;;  %219 = vadd.xlane.f32.xlu1 %v155_v52  ;;  %v176_v51 = vmul.f32 %v128_v47, %v80_v46  ;;  %v175_v52 = vmul.f32 %v127_v49, %v79_v48 }
  0x39   :  { %217 = vadd.xlane.f32.xlu0 %v154_v53  ;;  %v84_v53 = vld [vmem:[#allocation2 + $0x148] sm:$0xff] }
  0x3a   :  { %v180_v59 = vmul.f32 %v132_v54, %v84_v53 }
  0x3f   :  { %227 = vadd.xlane.f32.xlu2 %v159_v60  ;;  %225 = vadd.xlane.f32.xlu1 %v158_v61  ;;  %v179_v60 = vmul.f32 %v131_v56, %v83_v55  ;;  %v178_v61 = vmul.f32 %v130_v58, %v82_v57 }
  0x41   :  { %223 = vadd.xlane.f32.xlu0 %v157_v62  ;;  %v87_v62 = vld [vmem:[#allocation2 + $0x160] sm:$0xff] }
  0x42   :  { %v183_v4 = vmul.f32 %v135_v63, %v87_v62 }
  0x47   :  { %233 = vadd.xlane.f32.xlu2 %v162_v5  ;;  %231 = vadd.xlane.f32.xlu1 %v161_v6  ;;  %v182_v5 = vmul.f32 %v134_v1, %v86_v0  ;;  %v181_v6 = vmul.f32 %v133_v3, %v85_v2 }
  0x49   :  { %229 = vadd.xlane.f32.xlu0 %v160_v7  ;;  %v90_v7 = vld [vmem:[#allocation2 + $0x178] sm:$0xff] }
  0x4f   :  { %239 = vadd.xlane.f32.xlu2 %v165_v14  ;;  %237 = vadd.xlane.f32.xlu1 %v164_v15 }
  0x51   :  { %235 = vadd.xlane.f32.xlu0 %v163_v16  ;;  %v186_v16 = vmul.f32 %v138_v8, %v90_v7 }
  0x57   :  { %245 = vadd.xlane.f32.xlu2 %v168_v23  ;;  %243 = vadd.xlane.f32.xlu1 %v167_v24 }
  0x59   :  { %241 = vadd.xlane.f32.xlu0 %v166_v25 }
  0x5f   :  { %251 = vadd.xlane.f32.xlu2 %v171_v32  ;;  %249 = vadd.xlane.f32.xlu1 %v170_v33 }
  0x61   :  { %247 = vadd.xlane.f32.xlu0 %v169_v34 }
  0x67   :  { %257 = vadd.xlane.f32.xlu2 %v174_v41  ;;  %255 = vadd.xlane.f32.xlu1 %v173_v42 }
  0x69   :  { %253 = vadd.xlane.f32.xlu0 %v172_v43 }
  0x6f   :  { %263 = vadd.xlane.f32.xlu2 %v177_v50  ;;  %261 = vadd.xlane.f32.xlu1 %v176_v51 }
  0x71   :  { %259 = vadd.xlane.f32.xlu0 %v175_v52 }
  0x77   :  { %269 = vadd.xlane.f32.xlu2 %v180_v59  ;;  %267 = vadd.xlane.f32.xlu1 %v179_v60 }
  0x79   :  { %265 = vadd.xlane.f32.xlu0 %v178_v61 }
  0x7f   :  { %275 = vadd.xlane.f32.xlu2 %v183_v4  ;;  %273 = vadd.xlane.f32.xlu1 %v182_v5 }
  0x81   :  { %271 = vadd.xlane.f32.xlu0 %v181_v6 }
  0x82   :  { %v196_v13 = vpop.xlane.xlu2 %195  ;;  %v192_v14 = vpop.xlane.xlu1 %191 }
  0x83   :  { %288 = vst.msk [vmem:[%s613_s2 + $0x20] sm:$0xff] %vm283_vm0, %v196_v13 }
  0x84   :  { %v188_v15 = vpop.xlane.xlu0 %187  ;;  %286 = vst.msk [vmem:[%s613_s2 + $0x10] sm:$0xff] %vm283_vm0, %v192_v14 }
  0x85   :  { %284 = vst.msk [vmem:[%s613_s2] sm:$0xff] %vm283_vm0, %v188_v15 }
  0x87   :  { %281 = vadd.xlane.f32.xlu2 %v186_v16  ;;  %279 = vadd.xlane.f32.xlu1 %v185_v17 }
  0x89   :  { %277 = vadd.xlane.f32.xlu0 %v184_v18 }
  0x8a   :  { %v198_v19 = vpop.xlane.xlu2 %197  ;;  %v194_v20 = vpop.xlane.xlu1 %193 }
  0x8b   :  { %289 = vst.msk [vmem:[%s613_s2 + $0x28] sm:$0xff] %vm283_vm0, %v198_v19 }
  0x8c   :  { %v190_v21 = vpop.xlane.xlu0 %189  ;;  %287 = vst.msk [vmem:[%s613_s2 + $0x18] sm:$0xff] %vm283_vm0, %v194_v20 }
  0x8d   :  { %285 = vst.msk [vmem:[%s613_s2 + $0x8] sm:$0xff] %vm283_vm0, %v190_v21 }
  0x92   :  { %v204_v22 = vpop.xlane.xlu2 %203  ;;  %v202_v23 = vpop.xlane.xlu1 %201 }
  0x93   :  { %292 = vst.msk [vmem:[%s613_s2 + $0x40] sm:$0xff] %vm283_vm0, %v204_v22 }
  0x94   :  { %v200_v24 = vpop.xlane.xlu0 %199  ;;  %291 = vst.msk [vmem:[%s613_s2 + $0x38] sm:$0xff] %vm283_vm0, %v202_v23 }
  0x95   :  { %290 = vst.msk [vmem:[%s613_s2 + $0x30] sm:$0xff] %vm283_vm0, %v200_v24 }
  0x9a   :  { %v210_v25 = vpop.xlane.xlu2 %209  ;;  %v208_v26 = vpop.xlane.xlu1 %207 }
  0x9b   :  { %295 = vst.msk [vmem:[%s613_s2 + $0x58] sm:$0xff] %vm283_vm0, %v210_v25 }
  0x9c   :  { %v206_v27 = vpop.xlane.xlu0 %205  ;;  %294 = vst.msk [vmem:[%s613_s2 + $0x50] sm:$0xff] %vm283_vm0, %v208_v26 }
  0x9d   :  { %293 = vst.msk [vmem:[%s613_s2 + $0x48] sm:$0xff] %vm283_vm0, %v206_v27 }
  0xa2   :  { %v216_v28 = vpop.xlane.xlu2 %215  ;;  %v214_v29 = vpop.xlane.xlu1 %213 }
  0xa3   :  { %298 = vst.msk [vmem:[%s613_s2 + $0x70] sm:$0xff] %vm283_vm0, %v216_v28 }
  0xa4   :  { %v212_v30 = vpop.xlane.xlu0 %211  ;;  %297 = vst.msk [vmem:[%s613_s2 + $0x68] sm:$0xff] %vm283_vm0, %v214_v29 }
  0xa5   :  { %296 = vst.msk [vmem:[%s613_s2 + $0x60] sm:$0xff] %vm283_vm0, %v212_v30 }
  0xaa   :  { %v222_v31 = vpop.xlane.xlu2 %221  ;;  %v220_v32 = vpop.xlane.xlu1 %219 }
  0xab   :  { %301 = vst.msk [vmem:[%s613_s2 + $0x88] sm:$0xff] %vm283_vm0, %v222_v31 }
  0xac   :  { %v218_v33 = vpop.xlane.xlu0 %217  ;;  %300 = vst.msk [vmem:[%s613_s2 + $0x80] sm:$0xff] %vm283_vm0, %v220_v32 }
  0xad   :  { %299 = vst.msk [vmem:[%s613_s2 + $0x78] sm:$0xff] %vm283_vm0, %v218_v33 }
  0xb2   :  { %v228_v34 = vpop.xlane.xlu2 %227  ;;  %v226_v35 = vpop.xlane.xlu1 %225 }
  0xb3   :  { %304 = vst.msk [vmem:[%s613_s2 + $0xa0] sm:$0xff] %vm283_vm0, %v228_v34 }
  0xb4   :  { %v224_v36 = vpop.xlane.xlu0 %223  ;;  %303 = vst.msk [vmem:[%s613_s2 + $0x98] sm:$0xff] %vm283_vm0, %v226_v35 }
  0xb5   :  { %302 = vst.msk [vmem:[%s613_s2 + $0x90] sm:$0xff] %vm283_vm0, %v224_v36 }
  0xba   :  { %v234_v37 = vpop.xlane.xlu2 %233  ;;  %v232_v38 = vpop.xlane.xlu1 %231 }
  0xbb   :  { %307 = vst.msk [vmem:[%s613_s2 + $0xb8] sm:$0xff] %vm283_vm0, %v234_v37 }
  0xbc   :  { %v230_v39 = vpop.xlane.xlu0 %229  ;;  %306 = vst.msk [vmem:[%s613_s2 + $0xb0] sm:$0xff] %vm283_vm0, %v232_v38 }
  0xbd   :  { %305 = vst.msk [vmem:[%s613_s2 + $0xa8] sm:$0xff] %vm283_vm0, %v230_v39 }
  0xc2   :  { %v240_v40 = vpop.xlane.xlu2 %239  ;;  %v238_v41 = vpop.xlane.xlu1 %237 }
  0xc3   :  { %310 = vst.msk [vmem:[%s613_s2 + $0xd0] sm:$0xff] %vm283_vm0, %v240_v40 }
  0xc4   :  { %v236_v42 = vpop.xlane.xlu0 %235  ;;  %309 = vst.msk [vmem:[%s613_s2 + $0xc8] sm:$0xff] %vm283_vm0, %v238_v41 }
  0xc5   :  { %308 = vst.msk [vmem:[%s613_s2 + $0xc0] sm:$0xff] %vm283_vm0, %v236_v42 }
  0xca   :  { %v246_v43 = vpop.xlane.xlu2 %245  ;;  %v244_v44 = vpop.xlane.xlu1 %243 }
  0xcb   :  { %313 = vst.msk [vmem:[%s613_s2 + $0xe8] sm:$0xff] %vm283_vm0, %v246_v43 }
  0xcc   :  { %v242_v45 = vpop.xlane.xlu0 %241  ;;  %312 = vst.msk [vmem:[%s613_s2 + $0xe0] sm:$0xff] %vm283_vm0, %v244_v44 }
  0xcd   :  { %311 = vst.msk [vmem:[%s613_s2 + $0xd8] sm:$0xff] %vm283_vm0, %v242_v45 }
  0xd2   :  { %v252_v46 = vpop.xlane.xlu2 %251  ;;  %v250_v47 = vpop.xlane.xlu1 %249 }
  0xd3   :  { %316 = vst.msk [vmem:[%s613_s2 + $0x100] sm:$0xff] %vm283_vm0, %v252_v46 }
  0xd4   :  { %v248_v48 = vpop.xlane.xlu0 %247  ;;  %315 = vst.msk [vmem:[%s613_s2 + $0xf8] sm:$0xff] %vm283_vm0, %v250_v47 }
  0xd5   :  { %314 = vst.msk [vmem:[%s613_s2 + $0xf0] sm:$0xff] %vm283_vm0, %v248_v48 }
  0xda   :  { %v258_v49 = vpop.xlane.xlu2 %257  ;;  %v256_v50 = vpop.xlane.xlu1 %255 }
  0xdb   :  { %319 = vst.msk [vmem:[%s613_s2 + $0x118] sm:$0xff] %vm283_vm0, %v258_v49 }
  0xdc   :  { %v254_v51 = vpop.xlane.xlu0 %253  ;;  %318 = vst.msk [vmem:[%s613_s2 + $0x110] sm:$0xff] %vm283_vm0, %v256_v50 }
  0xdd   :  { %317 = vst.msk [vmem:[%s613_s2 + $0x108] sm:$0xff] %vm283_vm0, %v254_v51 }
  0xe2   :  { %v264_v52 = vpop.xlane.xlu2 %263  ;;  %v262_v53 = vpop.xlane.xlu1 %261 }
  0xe3   :  { %322 = vst.msk [vmem:[%s613_s2 + $0x130] sm:$0xff] %vm283_vm0, %v264_v52 }
  0xe4   :  { %v260_v54 = vpop.xlane.xlu0 %259  ;;  %321 = vst.msk [vmem:[%s613_s2 + $0x128] sm:$0xff] %vm283_vm0, %v262_v53 }
  0xe5   :  { %320 = vst.msk [vmem:[%s613_s2 + $0x120] sm:$0xff] %vm283_vm0, %v260_v54 }
  0xea   :  { %v270_v55 = vpop.xlane.xlu2 %269  ;;  %v268_v56 = vpop.xlane.xlu1 %267 }
  0xeb   :  { %325 = vst.msk [vmem:[%s613_s2 + $0x148] sm:$0xff] %vm283_vm0, %v270_v55 }
  0xec   :  { %v266_v57 = vpop.xlane.xlu0 %265  ;;  %324 = vst.msk [vmem:[%s613_s2 + $0x140] sm:$0xff] %vm283_vm0, %v268_v56 }
  0xed   :  { %323 = vst.msk [vmem:[%s613_s2 + $0x138] sm:$0xff] %vm283_vm0, %v266_v57 }
  0xf2   :  { %v276_v58 = vpop.xlane.xlu2 %275  ;;  %v274_v59 = vpop.xlane.xlu1 %273 }
  0xf3   :  { %328 = vst.msk [vmem:[%s613_s2 + $0x160] sm:$0xff] %vm283_vm0, %v276_v58 }
  0xf4   :  { %v272_v60 = vpop.xlane.xlu0 %271  ;;  %327 = vst.msk [vmem:[%s613_s2 + $0x158] sm:$0xff] %vm283_vm0, %v274_v59 }
  0xf5   :  { %326 = vst.msk [vmem:[%s613_s2 + $0x150] sm:$0xff] %vm283_vm0, %v272_v60 }
  0xfa   :  { %v282_v61 = vpop.xlane.xlu2 %281  ;;  %v280_v62 = vpop.xlane.xlu1 %279 }
  0xfb   :  { %331 = vst.msk [vmem:[%s613_s2 + $0x178] sm:$0xff] %vm283_vm0, %v282_v61 }
  0xfc   :  { %v278_v63 = vpop.xlane.xlu0 %277  ;;  %330 = vst.msk [vmem:[%s613_s2 + $0x170] sm:$0xff] %vm283_vm0, %v280_v62 }
  0xfd   :  { %329 = vst.msk [vmem:[%s613_s2 + $0x168] sm:$0xff] %vm283_vm0, %v278_v63 }
  0xfe   :  { %336 = vsyncpa [#allocation3], 1 }
  0xff   :  { %337 = vsyncpa [#allocation5], 1 }

</bundles_post_ra>
